<compile_context>
chip_gen: v5e
topology: v5e:2x2
jax: 0.10.0
libtpu: 0.0.40
codegen_flags: <defaults>
</compile_context>

<pallas_src>
import jax
import jax.numpy as jnp
from jax import lax
from jax.experimental import pallas as pl
from jax.experimental.pallas import tpu as pltpu

LANE = 128
SUBLANE = 8


def _round_up(x, m):
    return (x + m - 1) // m * m


# ---------------------------------------------------------------------------
# Kernel bodies
# ---------------------------------------------------------------------------

def _mlp_body(x_ref, w1_ref, b1_ref, w2_ref, b2_ref, w3_ref, b3_ref):
    """Fused fc1 -> ReLU -> fc2 -> ReLU -> fc3; returns f32 (tm, c_pad) logits."""
    # In-kernel cast of the raw f32 input to the MXU compute dtype (bf16).
    xb = x_ref[...].astype(w1_ref.dtype)
    h1 = jnp.dot(xb, w1_ref[...], preferred_element_type=jnp.float32)
    h1 = jnp.maximum(h1 + b1_ref[...], 0.0)
    h2 = jnp.dot(h1.astype(w2_ref.dtype), w2_ref[...],
                 preferred_element_type=jnp.float32)
    h2 = jnp.maximum(h2 + b2_ref[...], 0.0)
    out = jnp.dot(h2.astype(w3_ref.dtype), w3_ref[...],
                  preferred_element_type=jnp.float32)
    return out + b3_ref[...]


def _logits_kernel(x_ref, w1_ref, b1_ref, w2_ref, b2_ref, w3_ref, b3_ref, o_ref):
    o_ref[...] = _mlp_body(x_ref, w1_ref, b1_ref, w2_ref, b2_ref,
                           w3_ref, b3_ref).astype(o_ref.dtype)


def _make_argmax_kernel(num_classes):
    """Kernel variant that fuses argmax over the class dim (predict path)."""
    def kernel(x_ref, w1_ref, b1_ref, w2_ref, b2_ref, w3_ref, b3_ref, pred_ref):
        logits = _mlp_body(x_ref, w1_ref, b1_ref, w2_ref, b2_ref, w3_ref, b3_ref)
        c_pad = logits.shape[-1]
        col = lax.broadcasted_iota(jnp.int32, logits.shape, 1)
        # Mask padded class lanes to -inf before the cross-lane reduce.
        masked = jnp.where(col < num_classes, logits, -jnp.inf)
        row_max = jnp.max(masked, axis=-1, keepdims=True)
        # First index achieving the max (matches argmax tie semantics).
        first_hit = jnp.where(masked == row_max, col, c_pad)
        pred_ref[...] = jnp.min(first_hit, axis=-1, keepdims=True).astype(jnp.int32)
    return kernel


# ---------------------------------------------------------------------------
# Host-side wrappers
# ---------------------------------------------------------------------------

def prepare_params(params, compute_dtype=jnp.bfloat16):
    """One-time weight preparation: cast to bf16, pad fc3 to 128 class lanes."""
    w1, b1, w2, b2, w3, b3 = params
    f_in, h1_dim = w1.shape
    h2_dim = w2.shape[1]
    num_classes = w3.shape[1]
    c_pad = _round_up(num_classes, LANE)

    w1c = w1.astype(compute_dtype)                       # (42, 128)  K unpadded
    w2c = w2.astype(compute_dtype)                       # (128, 64)
    w3p = jnp.zeros((h2_dim, c_pad), compute_dtype).at[:, :num_classes].set(
        w3.astype(compute_dtype))                        # (64, 128)
    b1r = b1.reshape(1, h1_dim).astype(jnp.float32)
    b2r = b2.reshape(1, h2_dim).astype(jnp.float32)
    b3p = jnp.zeros((1, c_pad), jnp.float32).at[:, :num_classes].set(
        b3.reshape(1, num_classes).astype(jnp.float32))
    return (w1c, b1r, w2c, b2r, w3p, b3p), num_classes


def _choose_tile(B, tm_max, two_core_min=512):
    """Pick batch tile: sublane-aligned, minimal padding, >=2 tiles for v7x."""
    b_pad8 = _round_up(max(B, 1), SUBLANE)
    n_tiles = pl.cdiv(b_pad8, tm_max)
    if b_pad8 >= two_core_min:
        n_tiles = max(n_tiles, 2)          # keep both v7x TensorCores busy
    if n_tiles == 1:
        return B, 1, B                     # full-extent tile: no row padding
    tm = _round_up(pl.cdiv(b_pad8, n_tiles), SUBLANE)
    n_tiles = pl.cdiv(b_pad8, tm)
    return tm, n_tiles, n_tiles * tm


def _call_mlp(kernel_fn, x, prepared, out_lanes, out_dtype, tm_max):
    B, f_in = x.shape
    w1c, b1r, w2c, b2r, w3p, b3p = prepared
    tm, n_tiles, b_pad = _choose_tile(B, tm_max)
    if b_pad != B:
        x = jnp.pad(x, ((0, b_pad - B), (0, 0)))

    def const(a):
        # Constant block index: weights/biases fetched once, never re-DMA'd.
        return pl.BlockSpec(a.shape, lambda i: (0, 0))

    out = pl.pallas_call(
        kernel_fn,
        out_shape=jax.ShapeDtypeStruct((b_pad, out_lanes), out_dtype),
        grid=(n_tiles,),
        in_specs=[
            pl.BlockSpec((tm, f_in), lambda i: (i, 0)),   # unpadded x tile
            const(w1c), const(b1r),
            const(w2c), const(b2r),
            const(w3p), const(b3p),
        ],
        out_specs=pl.BlockSpec((tm, out_lanes), lambda i: (i, 0)),
        compiler_params=pltpu.CompilerParams(
            dimension_semantics=("parallel",),
            vmem_limit_bytes=32 * 1024 * 1024),
    )(x, w1c, b1r, w2c, b2r, w3p, b3p)
    return out, B


def gesture_mlp_forward(x, prepared, num_classes, *, out_dtype=jnp.bfloat16,
                        tm_max=4096):
    """x: (B, 42) float32 -> logits (B, num_classes) in out_dtype (bf16 default)."""
    c_pad = prepared[4].shape[1]   # padded class lanes of fc3
    out, B = _call_mlp(_logits_kernel, x, prepared, c_pad, out_dtype, tm_max)
    return out[:B, :num_classes]


def gesture_predict(x, prepared, num_classes, *, tm_max=4096):
    """Equivalent of GestureRecognitionModel.predict: fused in-kernel argmax."""
    squeeze = (x.ndim == 1)
    if squeeze:
        x = x[None, :]
    out, B = _call_mlp(_make_argmax_kernel(num_classes), x, prepared,
                       1, jnp.int32, tm_max)
    preds = out[:B, 0]
    return preds[0] if squeeze else preds


# ---------------------------------------------------------------------------
# Init + reference
# ---------------------------------------------------------------------------

def init_params(key, input_size=42, num_classes=50):
    """Deterministic init mimicking PyTorch nn.Linear defaults (+/- 1/sqrt(fan_in))."""
    dims = [(input_size, 128), (128, 64), (64, num_classes)]
    params = []
    for i, (fan_in, fan_out) in enumerate(dims):
        kw, kb = jax.random.split(jax.random.fold_in(key, i))
        bound = 1.0 / jnp.sqrt(float(fan_in))
        w = jax.random.uniform(kw, (fan_in, fan_out), jnp.float32, -bound, bound)
        b = jax.random.uniform(kb, (fan_out,), jnp.float32, -bound, bound)
        params.extend([w, b])
    return tuple(params)


def reference_forward(x, params, compute_dtype=jnp.float32):
    """Plain-JAX reference; compute_dtype rounds MXU operands like the kernel."""
    w1, b1, w2, b2, w3, b3 = params
    c = lambda a: a.astype(compute_dtype).astype(jnp.float32)
    h = jnp.maximum(c(x) @ c(w1) + b1.reshape(1, -1), 0.0)
    h = jnp.maximum(c(h) @ c(w2) + b2.reshape(1, -1), 0.0)
    return c(h) @ c(w3) + b3.reshape(1, -1)


if __name__ == "__main__":
    key = jax.random.PRNGKey(0)
    input_size, num_classes, batch = 42, 50, 2

    params = init_params(key, input_size, num_classes)
    prepared, nc = prepare_params(params)     # one-time weight bake

    x = jax.random.normal(jax.random.fold_in(key, 100), (batch, input_size),
                          dtype=jnp.float32)

    fwd = jax.jit(gesture_mlp_forward, static_argnums=(2,))
    pred_fn = jax.jit(gesture_predict, static_argnums=(2,))

    # Small-batch call (PyTorch .predict()-style usage).
    logits = jax.block_until_ready(fwd(x, prepared, nc))
    assert logits.shape == (batch, num_classes)
    ref = reference_forward(x, params, compute_dtype=jnp.bfloat16)
    assert jnp.allclose(logits.astype(jnp.float32), ref, atol=3e-2, rtol=2e-2), \
        float(jnp.max(jnp.abs(logits.astype(jnp.float32) - ref)))

    # Larger batch exercises the multi-tile / two-TensorCore path.
    xl = jax.random.normal(jax.random.fold_in(key, 200), (2048, input_size),
                           dtype=jnp.float32)
    logits_l = jax.block_until_ready(fwd(xl, prepared, nc))
    ref_l = reference_forward(xl, params, compute_dtype=jnp.bfloat16)
    assert logits_l.shape == (2048, num_classes)
    assert jnp.allclose(logits_l.astype(jnp.float32), ref_l, atol=3e-2, rtol=2e-2), \
        float(jnp.max(jnp.abs(logits_l.astype(jnp.float32) - ref_l)))

    # Fused-argmax predict: picked class must be within tolerance of the row max
    # (bf16 rounding may flip near-ties, so no hard argmax-equality check).
    preds = jax.block_until_ready(pred_fn(x, prepared, nc))
    assert preds.shape == (batch,) and preds.dtype == jnp.int32
    picked = jnp.take_along_axis(ref, preds[:, None].astype(jnp.int32), axis=1)[:, 0]
    assert bool(jnp.all(picked >= jnp.max(ref, axis=1) - 5e-2))

    preds_l = jax.block_until_ready(pred_fn(xl, prepared, nc))
    picked_l = jnp.take_along_axis(ref_l, preds_l[:, None].astype(jnp.int32), axis=1)[:, 0]
    assert bool(jnp.all(picked_l >= jnp.max(ref_l, axis=1) - 5e-2))

    # Single-keypoint-vector predict (matches torch .predict() unsqueeze path).
    _ = jax.block_until_ready(pred_fn(x[0], prepared, nc))

    print("KERNEL_OK")
</pallas_src>

<mosaic_0001>
module attributes {stable_mosaic.version = 11 : i64} {
  func.func @_logits_kernel(%arg0: i32, %arg1: memref<2x42xf32, #tpu.memory_space<vmem>>, %arg2: memref<42x128xbf16, #tpu.memory_space<vmem>>, %arg3: memref<1x128xf32, #tpu.memory_space<vmem>>, %arg4: memref<128x64xbf16, #tpu.memory_space<vmem>>, %arg5: memref<1x64xf32, #tpu.memory_space<vmem>>, %arg6: memref<64x128xbf16, #tpu.memory_space<vmem>>, %arg7: memref<1x128xf32, #tpu.memory_space<vmem>>, %arg8: memref<2x128xbf16, #tpu.memory_space<vmem>>) attributes {dimension_semantics = [#tpu.dimension_semantics<parallel>], iteration_bounds = array<i64: 1>, scalar_prefetch = 0 : i64, scratch_operands = 0 : i64, tpu.core_type = #tpu.core_type<tc>, window_params = [{transform_indices = @transform_0, window_bounds = array<i64: 2, 42>}, {pipeline_mode = #tpu.pipeline_mode<synchronous>, transform_indices = @transform_1, window_bounds = array<i64: 42, 128>}, {pipeline_mode = #tpu.pipeline_mode<synchronous>, transform_indices = @transform_2, window_bounds = array<i64: 1, 128>}, {pipeline_mode = #tpu.pipeline_mode<synchronous>, transform_indices = @transform_3, window_bounds = array<i64: 128, 64>}, {pipeline_mode = #tpu.pipeline_mode<synchronous>, transform_indices = @transform_4, window_bounds = array<i64: 1, 64>}, {pipeline_mode = #tpu.pipeline_mode<synchronous>, transform_indices = @transform_5, window_bounds = array<i64: 64, 128>}, {pipeline_mode = #tpu.pipeline_mode<synchronous>, transform_indices = @transform_6, window_bounds = array<i64: 1, 128>}, {transform_indices = @transform_7, window_bounds = array<i64: 2, 128>}]} {
    %c0 = arith.constant 0 : index
    %c0_0 = arith.constant 0 : index
    %0 = vector.load %arg1[%c0, %c0_0] : memref<2x42xf32, #tpu.memory_space<vmem>>, vector<2x42xf32>
    %1 = arith.truncf %0 : vector<2x42xf32> to vector<2x42xbf16>
    %c0_1 = arith.constant 0 : index
    %c0_2 = arith.constant 0 : index
    %2 = vector.load %arg2[%c0_1, %c0_2] : memref<42x128xbf16, #tpu.memory_space<vmem>>, vector<42x128xbf16>
    %cst = arith.constant dense<0.000000e+00> : vector<2x128xf32>
    %3 = tpu.matmul %1, %2, %cst {dimension_numbers = #tpu.dot_dimension_numbers<[1], [0], [0], [1], [0, 0, 1, 1], [], []>} : vector<2x42xbf16>, vector<42x128xbf16>, vector<2x128xf32> -> vector<2x128xf32>
    %c0_3 = arith.constant 0 : index
    %c0_4 = arith.constant 0 : index
    %4 = vector.load %arg3[%c0_3, %c0_4] : memref<1x128xf32, #tpu.memory_space<vmem>>, vector<1x128xf32>
    %5 = vector.broadcast %4 : vector<1x128xf32> to vector<2x128xf32>
    %6 = arith.addf %3, %5 : vector<2x128xf32>
    %cst_5 = arith.constant 0.000000e+00 : f32
    %7 = vector.broadcast %cst_5 : f32 to vector<2x128xf32>
    %8 = arith.maximumf %6, %7 : vector<2x128xf32>
    %9 = arith.truncf %8 : vector<2x128xf32> to vector<2x128xbf16>
    %c0_6 = arith.constant 0 : index
    %c0_7 = arith.constant 0 : index
    %10 = vector.load %arg4[%c0_6, %c0_7] : memref<128x64xbf16, #tpu.memory_space<vmem>>, vector<128x64xbf16>
    %cst_8 = arith.constant dense<0.000000e+00> : vector<2x64xf32>
    %11 = tpu.matmul %9, %10, %cst_8 {dimension_numbers = #tpu.dot_dimension_numbers<[1], [0], [0], [1], [0, 0, 1, 1], [], []>} : vector<2x128xbf16>, vector<128x64xbf16>, vector<2x64xf32> -> vector<2x64xf32>
    %c0_9 = arith.constant 0 : index
    %c0_10 = arith.constant 0 : index
    %12 = vector.load %arg5[%c0_9, %c0_10] : memref<1x64xf32, #tpu.memory_space<vmem>>, vector<1x64xf32>
    %13 = vector.broadcast %12 : vector<1x64xf32> to vector<2x64xf32>
    %14 = arith.addf %11, %13 : vector<2x64xf32>
    %cst_11 = arith.constant 0.000000e+00 : f32
    %15 = vector.broadcast %cst_11 : f32 to vector<2x64xf32>
    %16 = arith.maximumf %14, %15 : vector<2x64xf32>
    %17 = arith.truncf %16 : vector<2x64xf32> to vector<2x64xbf16>
    %c0_12 = arith.constant 0 : index
    %c0_13 = arith.constant 0 : index
    %18 = vector.load %arg6[%c0_12, %c0_13] : memref<64x128xbf16, #tpu.memory_space<vmem>>, vector<64x128xbf16>
    %cst_14 = arith.constant dense<0.000000e+00> : vector<2x128xf32>
    %19 = tpu.matmul %17, %18, %cst_14 {dimension_numbers = #tpu.dot_dimension_numbers<[1], [0], [0], [1], [0, 0, 1, 1], [], []>} : vector<2x64xbf16>, vector<64x128xbf16>, vector<2x128xf32> -> vector<2x128xf32>
    %c0_15 = arith.constant 0 : index
    %c0_16 = arith.constant 0 : index
    %20 = vector.load %arg7[%c0_15, %c0_16] : memref<1x128xf32, #tpu.memory_space<vmem>>, vector<1x128xf32>
    %21 = vector.broadcast %20 : vector<1x128xf32> to vector<2x128xf32>
    %22 = arith.addf %19, %21 : vector<2x128xf32>
    %23 = arith.truncf %22 : vector<2x128xf32> to vector<2x128xbf16>
    %c0_17 = arith.constant 0 : index
    %c0_18 = arith.constant 0 : index
    %24 = vector.load %arg8[%c0_17, %c0_18] : memref<2x128xbf16, #tpu.memory_space<vmem>>, vector<2x128xbf16>
    tpu.vector_store %arg8[%c0_17, %c0_18], %23 {strides = array<i32>} : memref<2x128xbf16, #tpu.memory_space<vmem>>, vector<2x128xbf16>,
    return
  }
  func.func @transform_0(%arg0: i32) -> (i32, i32) {
    %c0_i32 = arith.constant 0 : i32
    %c0_i32_0 = arith.constant 0 : i32
    return %arg0, %c0_i32 : i32, i32
  }
  func.func @transform_1(%arg0: i32) -> (i32, i32) {
    %c0_i32 = arith.constant 0 : i32
    %c0_i32_0 = arith.constant 0 : i32
    %c0_i32_1 = arith.constant 0 : i32
    return %c0_i32, %c0_i32_0 : i32, i32
  }
  func.func @transform_2(%arg0: i32) -> (i32, i32) {
    %c0_i32 = arith.constant 0 : i32
    %c0_i32_0 = arith.constant 0 : i32
    %c0_i32_1 = arith.constant 0 : i32
    return %c0_i32, %c0_i32_0 : i32, i32
  }
  func.func @transform_3(%arg0: i32) -> (i32, i32) {
    %c0_i32 = arith.constant 0 : i32
    %c0_i32_0 = arith.constant 0 : i32
    %c0_i32_1 = arith.constant 0 : i32
    return %c0_i32, %c0_i32_0 : i32, i32
  }
  func.func @transform_4(%arg0: i32) -> (i32, i32) {
    %c0_i32 = arith.constant 0 : i32
    %c0_i32_0 = arith.constant 0 : i32
    %c0_i32_1 = arith.constant 0 : i32
    return %c0_i32, %c0_i32_0 : i32, i32
  }
  func.func @transform_5(%arg0: i32) -> (i32, i32) {
    %c0_i32 = arith.constant 0 : i32
    %c0_i32_0 = arith.constant 0 : i32
    %c0_i32_1 = arith.constant 0 : i32
    return %c0_i32, %c0_i32_0 : i32, i32
  }
  func.func @transform_6(%arg0: i32) -> (i32, i32) {
    %c0_i32 = arith.constant 0 : i32
    %c0_i32_0 = arith.constant 0 : i32
    %c0_i32_1 = arith.constant 0 : i32
    return %c0_i32, %c0_i32_0 : i32, i32
  }
  func.func @transform_7(%arg0: i32) -> (i32, i32) {
    %c0_i32 = arith.constant 0 : i32
    %c0_i32_0 = arith.constant 0 : i32
    return %arg0, %c0_i32 : i32, i32
  }
}

</mosaic_0001>

<bundles_post_ra>
// kernel: gesture_mlp_forward.1
= control target key start
LH: loop header
LB: loop body
LE: loop exit
PB: predicated region body
PF: predicated region fallthrough
CT: control target
= control target key end

     0   :  { %vm61_vm0 = vcmask 1044480   ;;  %s445_s0 = inlined_call_operand.vmem [shape: f32[2,42], index: 0, kind: input, shape index: {}]   ;;  %s446_s1 = inlined_call_operand.vmem [shape: bf16[42,128], index: 1, kind: input, shape index: {}]   ;;  %s447_s2 = inlined_call_operand.vmem [shape: f32[1,128], index: 2, kind: input, shape index: {}]   ;;  %s448_s3 = inlined_call_operand.vmem [shape: bf16[128,64], index: 3, kind: input, shape index: {}]   ;;  %s449_s4 = inlined_call_operand.vmem [shape: f32[1,64], index: 4, kind: input, shape index: {}]   ;;  %s450_s5 = inlined_call_operand.vmem [shape: bf16[64,128], index: 5, kind: input, shape index: {}]   ;;  %s451_s6 = inlined_call_operand.vmem [shape: f32[1,128], index: 6, kind: input, shape index: {}]   ;;  %s452_s7 = inlined_call_operand.hbm [shape: bf16[2,128], index: 7, kind: output, shape index: {}]  }
   0x1   :  { %v244_v0 = vld [vmem:[%s446_s1 + $0x10] sm:$0xf]  ;;  %v298_v1 = vld [vmem:[%s446_s1 + $0x10] sm:$0x10]  ;;  %v306_v3 = vld [vmem:[%s448_s3 + $0x38] sm:$0xff] }
   0x2   :  { %v245_v2 = vor.u32 %v298_v1, %v244_v0  ;;  %148 = vmatpush.bf16.msra.mxu1 %v306_v3  ;;  %v305_v5 = vld [vmem:[%s448_s3 + $0x30] sm:$0xff]  ;;  %v297_v6 = vld [vmem:[%s446_s1 + $0x8] sm:$0xff] }
   0x4   :  { %v63_v4 = vsel %vm61_vm0, %v245_v2, 0 }
   0x5   :  { %70 = vmatpush.bf16.msra.mxu0 %v63_v4 }
   0x6   :  { %12 = vsyncpa [#allocation3], 0  ;;  %149 = vmatpush.bf16.msra.mxu1 %v305_v5  ;;  %v304_v7 = vld [vmem:[%s448_s3 + $0x28] sm:$0xff]  ;;  %v296_v8 = vld [vmem:[%s446_s1] sm:$0xff]  ;;  %vm57_vm1 = vcmask 343040   ;;  %vm199_vm2 = vcmask 523264  }
   0x7   :  { %v28_v9 = vld [vmem:[%s445_s0] sm:$0x3]  ;;  %v302_v12 = vld [vmem:[%s448_s3 + $0x18] sm:$0xff]  ;;  %v301_v13 = vld [vmem:[%s448_s3 + $0x10] sm:$0xff]  ;;  %s341_s14 = smov [#allocation2]   ;;  %s225_s17 = sshll.u32 %s452_s7, 4  ;;  %s226_s17 = int_to_ptr.hbm [resolvable:$true] %s225_s17 }
   0x8   :  { %v29_v10 = vpack.c.bf16 %v28_v9, %v28_v9  ;;  %v303_v11 = vld [vmem:[%s448_s3 + $0x20] sm:$0xff]  ;;  %v300_v14 = vld [vmem:[%s448_s3 + $0x8] sm:$0xff]  ;;  %v310_v16 = vld [vmem:[%s450_s5 + $0x18] sm:$0xff]  ;;  %s223_s15 = sshll.u32 %s341_s14, 4  ;;  %s224_s15 = int_to_ptr.vmem [resolvable:$true] %s223_s15 }
   0x9   :  { %71 = vmatpush.bf16.msra.mxu0 %v297_v6  ;;  %v299_v15 = vld [vmem:[%s448_s3] sm:$0xff]  ;;  %207 = vmatpush.bf16.msra.mxu2 %v310_v16  ;;  %v309_v17 = vld [vmem:[%s450_s5 + $0x10] sm:$0xff]  ;;  %v308_v24 = vld [vmem:[%s450_s5 + $0x8] sm:$0xff] }
   0xa   :  { %150 = vmatpush.bf16.msra.mxu1 %v304_v7  ;;  %v312_v18 = vld [vmem:[%s447_s2] ss:$0 sm:$0xff] }
   0xb   :  { %v307_v25 = vld [vmem:[%s450_s5] sm:$0xff] }
   0xc   :  { %v313_v26 = vld [vmem:[%s449_s4] ss:$0 sm:$0xff] }
   0xd   :  { %72 = vmatpush.bf16.msra.mxu0 %v296_v8  ;;  %208 = vmatpush.bf16.msra.mxu2 %v309_v17  ;;  %v314_v32 = vld [vmem:[%s451_s6] ss:$0 sm:$0xff] }
   0xe   :  { %151 = vmatpush.bf16.msra.mxu1 %v303_v11 }
  0x10   :  { %246 = vmatmul.msk.bf16.vlgmr.msra.gmra.mxu0 %vm57_vm1, %v29_v10 }
  0x11   :  { %209 = vmatpush.bf16.msra.mxu2 %v308_v24 }
  0x12   :  { %152 = vmatpush.bf16.msra.mxu1 %v302_v12 }
  0x15   :  { %210 = vmatpush.bf16.msra.mxu2 %v307_v25 }
  0x16   :  { %153 = vmatpush.bf16.msra.mxu1 %v301_v13 }
  0x1a   :  { %154 = vmatpush.bf16.msra.mxu1 %v300_v14 }
  0x1e   :  { %155 = vmatpush.bf16.msra.mxu1 %v299_v15 }
  0x8d   :  { %v74_v19 = vpop.f32.mrf.mxu0 }
  0x8e   :  { %v75_v20 = vadd.f32 %v312_v18, %v74_v19 }
  0x90   :  { %v78_v21 = vmax.f32 %v75_v20, 0.0 }
  0x92   :  { %v79_v22 = vpack.c.bf16 %v78_v21, %v78_v21 }
  0x94   :  { %156 = vmatmul.bf16.vlgmr.msra.gmra.mxu1 %v79_v22 }
  0x95   :  { %v76_v23 = vpop.f32.mrf.mxu0 }
 0x111   :  { %v157_v27 = vpop.f32.mrf.mxu1 }
 0x112   :  { %v158_v28 = vadd.f32 %v313_v26, %v157_v27 }
 0x114   :  { %v161_v29 = vmax.f32 %v158_v28, 0.0 }
 0x116   :  { %v162_v30 = vpack.c.bf16 %v161_v29, %v161_v29 }
 0x118   :  { %295 = vmatmul.msk.bf16.vlgmr.msra.gmra.mxu2 %vm199_vm2, %v162_v30 }
 0x119   :  { %v159_v31 = vpop.f32.mrf.mxu1 }
 0x19b   :  { %v212_v33 = vpop.f32.mrf.mxu2 }
 0x19c   :  { %v213_v34 = vadd.f32 %v314_v32, %v212_v33 }
 0x19e   :  { %v216_v35 = vpack.c.bf16 %v213_v34, %v213_v34 }
 0x1a0   :  { %217 = vst [vmem:[#allocation2] sm:$0x1] %v216_v35 }
 0x1a1   :  { %228 = dma.vmem_to_hbm [thread:$0]  %s224_s15, 16, %s226_s17, [#allocation3]  }
 0x1a3   :  { %v214_v36 = vpop.f32.mrf.mxu2 }
 0x1a4   :  { %339 = dma.done.wait [#allocation3], 16  }
 0x1a5   :  { %340 = vsyncadd [#allocation3], 4294967280 }
 0x1a6   :  { %233 = vsyncpa [#allocation3], 1 }

</bundles_post_ra>
